<compile_context>
chip_gen: v7x
topology: tpu7x:2x2x1
jax: 0.10.0
libtpu: 0.0.40
codegen_flags: <defaults>
</compile_context>

<pallas_src>
import jax
import jax.numpy as jnp
from jax.experimental import pallas as pl
from jax.experimental.pallas import tpu as pltpu

STYLE_DIM = 128          # D
NUM_LAYERS = 6           # L
BATCH = 8                # small-batch demo (grid=() path)
BIG_BATCH = 256          # batched demo (parallel-grid path)
BATCH_BLOCK = 128        # rows per grid step on the batched path
LR_MUL = 0.1

# Exact erf GELU by default (matches nn.GELU()).  True -> tanh approximation
# (moves the transcendental to the otherwise-idle EUP; ~1e-3 activation delta).
GELU_APPROXIMATE = False

# Standard contraction: activations (B, in) x weights (in, out) -> (B, out).
_DN_STD = (((1,), (0,)), ((), ()))


def _gelu(x):
    return jax.nn.gelu(x, approximate=GELU_APPROXIMATE)


# ----------------------------------------------------------------------------
# Standalone EqualLinear kernel (the original PyTorch module's forward).
# Kept in f32 for exact fidelity; lr_mul / transpose folded at prep time.
# NOTE: a lone (8,128)x(128,128) op never pays for a custom kernel -- in a
# production path either let XLA handle it or batch many applications per call.
# ----------------------------------------------------------------------------
def equal_linear_kernel(x_ref, w_ref, b_ref, out_ref):
    # x_ref: (B, in); w_ref: (in, out) pre-scaled & pre-transposed; b_ref: (1, out)
    out_ref[...] = jax.lax.dot_general(
        x_ref[...], w_ref[...], _DN_STD,
        preferred_element_type=jnp.float32) + b_ref[...]


def prepare_equal_linear_params(w, b, *, lr_mul=LR_MUL, weight_dtype=jnp.float32):
    """One-time cached prep: fold lr_mul, transpose to (in, out)."""
    w_t = (w * lr_mul).T.astype(weight_dtype)          # (in, out)
    b_s = (b * lr_mul).reshape(1, -1).astype(jnp.float32)
    return w_t, b_s


def equal_linear(x, w_t, b_s):
    B = x.shape[0]
    out_dim = w_t.shape[1]
    vmem = pl.BlockSpec(memory_space=pltpu.MemorySpace.VMEM)
    return pl.pallas_call(
        equal_linear_kernel,
        out_shape=jax.ShapeDtypeStruct((B, out_dim), jnp.float32),
        in_specs=[vmem] * 3,
        out_specs=vmem,
    )(x, w_t, b_s)


# ----------------------------------------------------------------------------
# Full reversible mapping network (6 blocks of 2 EqualLinear + GELU each).
# ----------------------------------------------------------------------------
def mapping_kernel(x1_ref, x2_ref, wf_ref, bf_ref, wg_ref, bg_ref, out_ref):
    # x1_ref/x2_ref: (TB, D) f32 halves of repeat_interleave(x, 2)
    # wf_ref/wg_ref: (L, D, D) bf16, lr folded, (in, out) layout
    # bf_ref/bg_ref: (L, 1, D) f32, lr folded
    x1 = x1_ref[...]
    x2 = x2_ref[...]
    for l in range(NUM_LAYERS):
        # f branch: y1 = x1 + GELU((x2 @ Wf_prep[l]) + bf_prep[l])
        # bf16 inputs -> single-pass MXU, f32 accumulate; weight read adjacent
        # to its dot (spill hygiene).
        h_f = jax.lax.dot_general(
            x2.astype(wf_ref.dtype), wf_ref[l], _DN_STD,
            preferred_element_type=jnp.float32) + bf_ref[l]
        x1 = x1 + _gelu(h_f)
        # g branch: y2 = x2 + GELU((y1 @ Wg_prep[l]) + bg_prep[l])
        h_g = jax.lax.dot_general(
            x1.astype(wg_ref.dtype), wg_ref[l], _DN_STD,
            preferred_element_type=jnp.float32) + bg_ref[l]
        x2 = x2 + _gelu(h_g)
    out_ref[...] = (x1 + x2) * 0.5


def prepare_mapping_params(wf, bf, wg, bg, *, lr_mul=LR_MUL,
                           weight_dtype=jnp.bfloat16):
    """One-time (cached) parameter prep:
      * fold lr_mul into weights and biases,
      * transpose weights to (L, in, out) -> standard contraction, no in-kernel
        or per-call transpose,
      * cast weights to bf16 (halves weight DMA, single-pass MXU); biases stay
        f32 (elementwise path stays f32 on all generations)."""
    L, out_dim, _ = wf.shape
    wf_t = jnp.transpose(wf * lr_mul, (0, 2, 1)).astype(weight_dtype)
    wg_t = jnp.transpose(wg * lr_mul, (0, 2, 1)).astype(weight_dtype)
    bf_s = (bf * lr_mul).reshape(L, 1, out_dim).astype(jnp.float32)
    bg_s = (bg * lr_mul).reshape(L, 1, out_dim).astype(jnp.float32)
    return wf_t, bf_s, wg_t, bg_s


def mapping_network(x, wf_t, bf_s, wg_t, bg_s, *, batch_block=BATCH_BLOCK):
    """x: (B, D) f32.  Params must come from prepare_mapping_params (cached)."""
    B, D = x.shape
    L = wf_t.shape[0]
    # repeat_interleave + chunk in the wrapper (exact, ~8 KiB of traffic).
    x_rep = jnp.repeat(x, 2, axis=1)            # (B, 2D)
    x1 = x_rep[:, :D]
    x2 = x_rep[:, D:]
    out_shape = jax.ShapeDtypeStruct((B, D), jnp.float32)

    if B >= 2 * batch_block and B % batch_block == 0:
        # Batched path: "parallel" batch grid so v7x's two TensorCores /
        # megacore each take part of the batch.  Weight block index is constant
        # -> weights are DMA'd once and stay resident across grid steps.
        act_spec = pl.BlockSpec((batch_block, D), lambda i: (i, 0))
        w_spec = pl.BlockSpec((L, D, D), lambda i: (0, 0, 0))
        b_spec = pl.BlockSpec((L, 1, D), lambda i: (0, 0, 0))
        return pl.pallas_call(
            mapping_kernel,
            out_shape=out_shape,
            grid=(B // batch_block,),
            in_specs=[act_spec, act_spec, w_spec, b_spec, w_spec, b_spec],
            out_specs=act_spec,
            compiler_params=pltpu.CompilerParams(
                dimension_semantics=("parallel",)),
        )(x1, x2, wf_t, bf_s, wg_t, bg_s)

    # Small-batch path: grid=() whole-network-in-VMEM (~0.4 MiB resident;
    # far under VMEM on v5e/v6e/v7x, and a per-layer grid would only add
    # ~0.35 us/step of overhead to hide <0.5 us of DMA).
    vmem = pl.BlockSpec(memory_space=pltpu.MemorySpace.VMEM)
    return pl.pallas_call(
        mapping_kernel,
        out_shape=out_shape,
        in_specs=[vmem] * 6,
        out_specs=vmem,
    )(x1, x2, wf_t, bf_s, wg_t, bg_s)


# ----------------------------------------------------------------------------
# Pure-JAX references.
# ----------------------------------------------------------------------------
def equal_linear_ref(x, w, b, lr_mul=LR_MUL):
    # Exact PyTorch forward semantics.
    return x @ (w * lr_mul).T + b * lr_mul


def mapping_network_ref(x, wf, bf, wg, bg):
    """Original full-f32 semantics (nn.GELU() = exact erf)."""
    D = x.shape[1]
    x_rep = jnp.repeat(x, 2, axis=1)
    x1, x2 = x_rep[:, :D], x_rep[:, D:]
    for l in range(NUM_LAYERS):
        x1 = x1 + jax.nn.gelu(equal_linear_ref(x2, wf[l], bf[l]), approximate=False)
        x2 = x2 + jax.nn.gelu(equal_linear_ref(x1, wg[l], bg[l]), approximate=False)
    return (x1 + x2) / 2.0


def mapping_network_prep_ref(x, wf_t, bf_s, wg_t, bg_s):
    """Pure-JAX mirror of the kernel math using the SAME prepped (bf16) params,
    to validate the kernel independently of the bf16 quantization error."""
    D = x.shape[1]
    x_rep = jnp.repeat(x, 2, axis=1)
    x1, x2 = x_rep[:, :D], x_rep[:, D:]
    for l in range(NUM_LAYERS):
        h = jnp.dot(x2.astype(wf_t.dtype), wf_t[l],
                    preferred_element_type=jnp.float32) + bf_s[l]
        x1 = x1 + _gelu(h)
        h = jnp.dot(x1.astype(wg_t.dtype), wg_t[l],
                    preferred_element_type=jnp.float32) + bg_s[l]
        x2 = x2 + _gelu(h)
    return (x1 + x2) * 0.5


if __name__ == "__main__":
    key = jax.random.PRNGKey(0)
    k_x, k_xb, k_wf, k_wg, k_bf, k_bg, k_b = jax.random.split(key, 7)

    x = jax.random.normal(k_x, (BATCH, STYLE_DIM), dtype=jnp.float32)
    # EqualLinear params: weight ~ randn(out, in); random biases to exercise
    # the bias path (module inits them to zero, forward handles any value).
    wf = jax.random.normal(k_wf, (NUM_LAYERS, STYLE_DIM, STYLE_DIM), dtype=jnp.float32)
    wg = jax.random.normal(k_wg, (NUM_LAYERS, STYLE_DIM, STYLE_DIM), dtype=jnp.float32)
    bf = jax.random.normal(k_bf, (NUM_LAYERS, STYLE_DIM), dtype=jnp.float32)
    bg = jax.random.normal(k_bg, (NUM_LAYERS, STYLE_DIM), dtype=jnp.float32)

    # 1) Standalone EqualLinear (the spec module), f32-exact, non-zero bias.
    b_test = jax.random.normal(k_b, (STYLE_DIM,), dtype=jnp.float32)
    w_t_el, b_s_el = prepare_equal_linear_params(wf[0], b_test)   # cached prep
    el_out = jax.block_until_ready(jax.jit(equal_linear)(x, w_t_el, b_s_el))
    el_ref = equal_linear_ref(x, wf[0], b_test)
    assert el_out.shape == (BATCH, STYLE_DIM)
    assert jnp.allclose(el_out, el_ref, atol=1e-4, rtol=1e-4), "EqualLinear mismatch"

    # 2) Mapping network, small batch -> grid=() whole-network-in-VMEM path.
    params = prepare_mapping_params(wf, bf, wg, bg)               # cached prep (bf16)
    mapping_jit = jax.jit(mapping_network)
    out = jax.block_until_ready(mapping_jit(x, *params))
    assert out.shape == (BATCH, STYLE_DIM)
    # 2a) Tight check against a pure-JAX mirror of the exact kernel math.
    ref_match = jax.jit(mapping_network_prep_ref)(x, *params)
    assert jnp.allclose(out, ref_match, atol=2e-2, rtol=2e-2), "kernel math mismatch"
    # 2b) Loose, scale-relative check against the original full-f32 semantics
    #     (bf16 weight quantization compounds over 6 reversible blocks).
    ref_f32 = jax.jit(mapping_network_ref)(x, wf, bf, wg, bg)
    rel_err = float(jnp.max(jnp.abs(out - ref_f32)) / jnp.max(jnp.abs(ref_f32)))
    assert rel_err < 0.1, f"bf16 mapping network drifted too far: {rel_err}"

    # 3) Batched path (v6e/v7x occupancy / dual-TC sharding): grid=(2,), parallel.
    xb = jax.random.normal(k_xb, (BIG_BATCH, STYLE_DIM), dtype=jnp.float32)
    out_b = jax.block_until_ready(mapping_jit(xb, *params))
    ref_b = jax.jit(mapping_network_prep_ref)(xb, *params)
    assert out_b.shape == (BIG_BATCH, STYLE_DIM)
    assert jnp.allclose(out_b, ref_b, atol=2e-2, rtol=2e-2), "batched path mismatch"

    print("KERNEL_OK")
</pallas_src>

<mosaic_0001>
module attributes {stable_mosaic.version = 11 : i64} {
  func.func @equal_linear_kernel(%arg0: memref<8x128xf32, #tpu.memory_space<vmem>>, %arg1: memref<128x128xf32, #tpu.memory_space<vmem>>, %arg2: memref<1x128xf32, #tpu.memory_space<vmem>>, %arg3: memref<8x128xf32, #tpu.memory_space<vmem>>) attributes {dimension_semantics = [], scalar_prefetch = 0 : i64, scratch_operands = 0 : i64, tpu.core_type = #tpu.core_type<tc>} {
    %c0 = arith.constant 0 : index
    %c0_0 = arith.constant 0 : index
    %0 = vector.load %arg0[%c0, %c0_0] : memref<8x128xf32, #tpu.memory_space<vmem>>, vector<8x128xf32>
    %c0_1 = arith.constant 0 : index
    %c0_2 = arith.constant 0 : index
    %1 = vector.load %arg1[%c0_1, %c0_2] : memref<128x128xf32, #tpu.memory_space<vmem>>, vector<128x128xf32>
    %cst = arith.constant dense<0.000000e+00> : vector<8x128xf32>
    %2 = tpu.matmul %0, %1, %cst {dimension_numbers = #tpu.dot_dimension_numbers<[1], [0], [0], [1], [0, 0, 1, 1], [], []>} : vector<8x128xf32>, vector<128x128xf32>, vector<8x128xf32> -> vector<8x128xf32>
    %c0_3 = arith.constant 0 : index
    %c0_4 = arith.constant 0 : index
    %3 = vector.load %arg2[%c0_3, %c0_4] : memref<1x128xf32, #tpu.memory_space<vmem>>, vector<1x128xf32>
    %4 = vector.broadcast %3 : vector<1x128xf32> to vector<8x128xf32>
    %5 = arith.addf %2, %4 : vector<8x128xf32>
    %c0_5 = arith.constant 0 : index
    %c0_6 = arith.constant 0 : index
    %6 = vector.load %arg3[%c0_5, %c0_6] : memref<8x128xf32, #tpu.memory_space<vmem>>, vector<8x128xf32>
    tpu.vector_store %arg3[%c0_5, %c0_6], %5 {strides = array<i32>} : memref<8x128xf32, #tpu.memory_space<vmem>>, vector<8x128xf32>,
    return
  }
}

</mosaic_0001>

<bundles_post_ra>
// kernel: equal_linear.1
= control target key start
LH: loop header
LB: loop body
LE: loop exit
PB: predicated region body
PF: predicated region fallthrough
CT: control target
= control target key end

     0   :  { %8 = vsyncpa [#allocation3], 0  ;;  %s383_s0 = inlined_call_operand.hbm [shape: f32[8,128], index: 0, kind: input, shape index: {}]   ;;  %s384_s1 = inlined_call_operand.hbm [shape: f32[128,128], index: 1, kind: input, shape index: {}]   ;;  %s385_s2 = inlined_call_operand.vmem [shape: f32[1,128], index: 2, kind: input, shape index: {}]   ;;  %s386_s3 = inlined_call_operand.hbm [shape: f32[8,128], index: 3, kind: output, shape index: {}]  }
   0x1   :  { %9 = vsyncpa [#allocation6], 0 }
   0x2   :  { %10 = vsyncpa [#allocation4], 0  ;;  %s309_s12 = smov [#allocation2]   ;;  %s310_s14 = smov [#allocation5]  }
   0x3   :  { %s17_s13 = sshll.u32 %s309_s12, 4  ;;  %s26_s15 = sshll.u32 %s310_s14, 4  ;;  %s18_s13 = int_to_ptr.vmem [resolvable:$true] %s17_s13  ;;  %s337_s15 = int_to_ptr.vmem [resolvable:$true] %s26_s15 }
   0x4   :  { %s237_s18 = scalar_lea.hbm %s383_s0, 128 }
   0x5   :  { %p238_p0 = scmp.ne.s32.totalorder %s383_s0, %s237_s18  ;;  %p241_p1 = scmp.lt.u32.totalorder %s237_s18, %s383_s0 }
   0x7   :  { %p243_p2 = pnand %p241_p1, %p238_p0 }
   0x9   :  { %246 = shalt.err (!%p243_p2)
}
   0xa   :  { %s247_s23 = scalar_lea.vmem %s18_s13, 128  ;;  %p252_p4 = scmp.lt.s32.totalorder %s18_s13, %s18_s13 }
   0xb   :  { %p248_p3 = scmp.ne.s32.totalorder %s18_s13, %s247_s23  ;;  %p253_p5 = scmp.lt.s32.totalorder %s247_s23, %s247_s23 }
   0xd   :  { %p254_p6 = por %p253_p5, %p252_p4 }
   0xf   :  { %p255_p7 = pnand %p254_p6, %p248_p3 }
  0x11   :  { %258 = shalt.err (!%p255_p7)
}
  0x12   :  { %20 = dma.hbm_to_vmem [thread:$0]  %s383_s0, 128, %s18_s13, [#allocation3]  }
  0x13   :  { %s259_s28 = scalar_lea.hbm %s384_s1, 2048 }
  0x14   :  { %p260_p8 = scmp.ne.s32.totalorder %s384_s1, %s259_s28  ;;  %p263_p9 = scmp.lt.u32.totalorder %s259_s28, %s384_s1 }
  0x16   :  { %p265_p10 = pnand %p263_p9, %p260_p8 }
  0x18   :  { %268 = shalt.err (!%p265_p10)
}
  0x19   :  { %s269_s6 = scalar_lea.vmem %s337_s15, 2048  ;;  %p274_p12 = scmp.lt.s32.totalorder %s337_s15, %s337_s15 }
  0x1a   :  { %p270_p11 = scmp.ne.s32.totalorder %s337_s15, %s269_s6  ;;  %p275_p13 = scmp.lt.s32.totalorder %s269_s6, %s269_s6 }
  0x1c   :  { %p276_p0 = por %p275_p13, %p274_p12 }
  0x1e   :  { %p277_p1 = pnand %p276_p0, %p270_p11 }
  0x20   :  { %280 = shalt.err (!%p277_p1)
}
  0x21   :  { %s311_s0 = smov 128   ;;  %s312_s7 = smov 8  }
  0x22   :  { %32 = dma.hbm_to_vmem [thread:$0]  %s384_s1, 2048, %s337_s15, [#allocation6], %s311_s0, %s311_s0, %s312_s7  }
  0x23   :  { %303 = dma.done.wait [#allocation3], 128  }
  0x24   :  { %304 = vsyncadd [#allocation3], 4294967168 }
  0x25   :  { %305 = dma.done.wait [#allocation6], 2048  }
  0x26   :  { %306 = vsyncadd [#allocation6], 4294965248  ;;  %v313_v0 = vmov 0.0|0.0   ;;  %vm314_vm0 = vmmov 0   ;;  %v315_v1 = vmov 0.0   ;;  %v42_v2 = vld [vmem:[#allocation5] sm:$0xff] }
  0x27   :  { %205 = vmatprep.subr.bf16.mxu0 %v313_v0  ;;  %202 = vmatprep.mubr.msk.f32.mxu0 %vm314_vm0, %v315_v1  ;;  %v43_v3 = vld [vmem:[#allocation5 + $0x8] sm:$0xff]  ;;  %v44_v4 = vld [vmem:[#allocation5 + $0x10] sm:$0xff]  ;;  %v45_v6 = vld [vmem:[#allocation5 + $0x18] sm:$0xff]  ;;  %s316_s11 = smov [#allocation7]  }
  0x28   :  { %v206_v5 = vpack.c.bf16 %v43_v3, %v42_v2  ;;  %v209_v7 = vpack.c.bf16 %v45_v6, %v44_v4  ;;  %v46_v8 = vld [vmem:[#allocation5 + $0x20] sm:$0xff]  ;;  %v47_v9 = vld [vmem:[#allocation5 + $0x28] sm:$0xff]  ;;  %v48_v11 = vld [vmem:[#allocation5 + $0x30] sm:$0xff]  ;;  %s142_s12 = sshll.u32 %s316_s11, 4  ;;  %s143_s12 = int_to_ptr.vmem [resolvable:$true] %s142_s12 }
  0x29   :  { %v212_v10 = vpack.c.bf16 %v47_v9, %v46_v8  ;;  %v49_v12 = vld [vmem:[#allocation5 + $0x38] sm:$0xff]  ;;  %v50_v14 = vld [vmem:[#allocation5 + $0x40] sm:$0xff]  ;;  %v51_v15 = vld [vmem:[#allocation5 + $0x48] sm:$0xff]  ;;  %s281_s13 = scalar_lea.vmem %s143_s12, 128  ;;  %p286_p3 = scmp.lt.s32.totalorder %s143_s12, %s143_s12 }
  0x2a   :  { %207 = vmatpush3.bf16.msra.mxu0 %v206_v5  ;;  %v215_v13 = vpack.c.bf16 %v49_v12, %v48_v11  ;;  %v218_v16 = vpack.c.bf16 %v51_v15, %v50_v14  ;;  %v52_v17 = vld [vmem:[#allocation5 + $0x50] sm:$0xff]  ;;  %v53_v18 = vld [vmem:[#allocation5 + $0x58] sm:$0xff]  ;;  %v54_v20 = vld [vmem:[#allocation5 + $0x60] sm:$0xff]  ;;  %p282_p2 = scmp.ne.s32.totalorder %s143_s12, %s281_s13  ;;  %p287_p4 = scmp.lt.s32.totalorder %s281_s13, %s281_s13 }
  0x2b   :  { %208 = vmatprep.subr.bf16.mxu0 %v313_v0  ;;  %v221_v19 = vpack.c.bf16 %v53_v18, %v52_v17  ;;  %v55_v21 = vld [vmem:[#allocation5 + $0x68] sm:$0xff]  ;;  %v56_v23 = vld [vmem:[#allocation5 + $0x70] sm:$0xff]  ;;  %v57_v24 = vld [vmem:[#allocation5 + $0x78] sm:$0xff] }
  0x2c   :  { %v224_v22 = vpack.c.bf16 %v55_v21, %v54_v20  ;;  %v227_v25 = vpack.c.bf16 %v57_v24, %v56_v23  ;;  %v41_v26 = vld [vmem:[#allocation2] sm:$0xff]  ;;  %p288_p5 = por %p287_p4, %p286_p3 }
  0x2d   :  { %v152_v27 = vld [vmem:[%s385_s2] ss:$0 sm:$0xff] }
  0x2e   :  { %210 = vmatpush3.bf16.msra.mxu0 %v209_v7  ;;  %p289_p6 = pnand %p288_p5, %p282_p2 }
  0x2f   :  { %211 = vmatprep.subr.bf16.mxu0 %v313_v0 }
  0x32   :  { %213 = vmatpush3.bf16.msra.mxu0 %v212_v10 }
  0x33   :  { %214 = vmatprep.subr.bf16.mxu0 %v313_v0 }
  0x36   :  { %216 = vmatpush3.bf16.msra.mxu0 %v215_v13 }
  0x37   :  { %217 = vmatprep.subr.bf16.mxu0 %v313_v0 }
  0x3a   :  { %219 = vmatpush3.bf16.msra.mxu0 %v218_v16 }
  0x3b   :  { %220 = vmatprep.subr.bf16.mxu0 %v313_v0 }
  0x3e   :  { %222 = vmatpush3.bf16.msra.mxu0 %v221_v19 }
  0x3f   :  { %223 = vmatprep.subr.bf16.mxu0 %v313_v0 }
  0x42   :  { %225 = vmatpush3.bf16.msra.mxu0 %v224_v22 }
  0x43   :  { %226 = vmatprep.subr.bf16.mxu0 %v313_v0 }
  0x46   :  { %228 = vmatpush3.bf16.msra.mxu0 %v227_v25 }
  0x49   :  { %203 = vmatmul.mubr.f32.vlgmr.msra.gmra.mrb[0].mxu0 %v41_v26 }
 0x11c   :  { %v131_v28 = vpop.f32.mrb[0].mxu0 }
 0x11d   :  { %v132_v29 = vadd.f32 %v152_v27, %v131_v28  ;;  %v204_v30 = vpop.f32.mrb[1].mxu0 }
 0x11f   :  { %135 = vst [vmem:[#allocation7] sm:$0xff] %v132_v29 }
 0x120   :  { %292 = shalt.err (!%p289_p6)
}
 0x121   :  { %s293_s16 = scalar_lea.hbm %s386_s3, 128 }
 0x122   :  { %p294_p7 = scmp.ne.s32.totalorder %s386_s3, %s293_s16  ;;  %p297_p8 = scmp.lt.u32.totalorder %s293_s16, %s386_s3 }
 0x124   :  { %p299_p9 = pnand %p297_p8, %p294_p7 }
 0x126   :  { %302 = shalt.err (!%p299_p9)
}
 0x127   :  { %145 = dma.vmem_to_hbm [thread:$0]  %s143_s12, 128, %s386_s3, [#allocation4]  }
 0x128   :  { %307 = dma.done.wait [#allocation4], 128  }
 0x129   :  { %308 = vsyncadd [#allocation4], 4294967168 }
 0x12a   :  { %149 = vsyncpa [#allocation3], 1 }
 0x12b   :  { %150 = vsyncpa [#allocation6], 1 }
 0x12c   :  { %151 = vsyncpa [#allocation4], 1 }

</bundles_post_ra>
